<compile_context>
chip_gen: v7x
topology: tpu7x:2x2x1
jax: 0.10.0
libtpu: 0.0.40
codegen_flags: <defaults>
</compile_context>

<pallas_src>
import math

import jax
import jax.numpy as jnp
from jax.experimental import pallas as pl
from jax.experimental.pallas import tpu as pltpu


def _periodic_emb_kernel(x_ref, s_ref, phase_ref, out_ref):
    # x_ref:     (TILE, g*F)   g batch rows folded into each sublane row
    # s_ref:     (g*F, g*D)    block-diagonal scatter matrix (2*pi folded in)
    # phase_ref: (1, g*D)      pi/2 on cos lanes, 0 on sin lanes
    # out_ref:   (TILE, g*D)   lane-dense flat output (single unmasked store)
    v = jnp.dot(
        x_ref[...],
        s_ref[...],
        preferred_element_type=jnp.float32,
        precision=jax.lax.Precision.HIGHEST,  # keep f32-exact products on the MXU
    )
    # cos(t) = sin(t + pi/2): exactly one EUP transcendental per output element.
    out_ref[...] = jnp.sin(v + phase_ref[...]).astype(out_ref.dtype)


def periodic_embeddings(x, frequencies, *, out_dtype=jnp.float32,
                        target_tile_bytes=4 << 20):
    """x: (B, F) f32, frequencies: (F, K) f32 -> (B, F, 2K) (cos | sin, torch.cat order)."""
    B, F = x.shape
    F2, K = frequencies.shape
    assert F == F2, "frequencies must be (n_features, n_frequencies)"
    D = F * 2 * K
    out_bytes = jnp.dtype(out_dtype).itemsize
    sublane = 8 if out_bytes >= 4 else 16  # bf16 output -> 16-row packing

    def cdiv(a, b):
        return (a + b - 1) // b

    # ---- row-folding factor g: make the output lane width g*D a multiple of 128
    # (unmasked vst) and >= 512 lanes when the scatter matrix stays small. ----
    def s_big_bytes(gg):
        return (gg * F) * (gg * D) * 4

    g = 128 // math.gcd(D, 128)  # 1 if D already a multiple of 128
    if s_big_bytes(g) > (8 << 20):
        # TODO(synk): pathological D -> fall back to unfolded (masked) stores.
        g = 1
    else:
        while g * D < 512 and s_big_bytes(2 * g) <= (2 << 20):
            g *= 2

    # ---- wrapper-side constants (built once, loop-invariant across the grid) ----
    w2 = (2.0 * math.pi) * jnp.concatenate(
        [frequencies, frequencies], axis=-1).astype(jnp.float32)          # (F, 2K)
    # S_big[i*F+f, j*D + h*2K + k] = eye_g[i,j] * eye_F[f,h] * w2[f,k]
    s_big = jnp.einsum(
        "ij,fh,fk->ifjhk",
        jnp.eye(g, dtype=jnp.float32),
        jnp.eye(F, dtype=jnp.float32),
        w2,
    ).reshape(g * F, g * D)
    phase_feat = jnp.concatenate(
        [jnp.full((K,), 0.5 * math.pi, jnp.float32), jnp.zeros((K,), jnp.float32)])
    phase = jnp.tile(phase_feat, F * g)[None, :]                           # (1, g*D)

    # ---- tile sizing on the folded view (rows of g batch rows each) ----
    folded_rows = cdiv(B, g)
    row_bytes = g * D * out_bytes
    tile = max(sublane, (target_tile_bytes // max(row_bytes, 1)) // sublane * sublane)
    if folded_rows >= 2 * sublane:
        # guarantee >= 2 grid steps so the "parallel" axis shards across v7x's 2 TCs
        tile = min(tile, cdiv(cdiv(folded_rows, 2), sublane) * sublane)
    tile = min(tile, cdiv(folded_rows, sublane) * sublane)
    n_tiles = cdiv(folded_rows, tile)
    folded_pad = n_tiles * tile
    B_pad = folded_pad * g

    x_in = x.astype(jnp.float32)
    if B_pad != B:
        x_in = jnp.pad(x_in, ((0, B_pad - B), (0, 0)))
    x_folded = x_in.reshape(folded_pad, g * F)  # free row-major fold

    out_flat = pl.pallas_call(
        _periodic_emb_kernel,
        out_shape=jax.ShapeDtypeStruct((folded_pad, g * D), out_dtype),
        grid_spec=pltpu.PrefetchScalarGridSpec(
            num_scalar_prefetch=0,
            grid=(n_tiles,),
            in_specs=[
                # batch tile of folded x; lane dim equals full array dim
                pl.BlockSpec((tile, g * F), lambda b: (b, 0)),
                # block-diagonal scatter matrix, identical block every step
                pl.BlockSpec((g * F, g * D), lambda b: (0, 0)),
                # phase row, identical block every step
                pl.BlockSpec((1, g * D), lambda b: (0, 0)),
            ],
            # lane-dense output block: width is a multiple of 128 -> unmasked vst
            out_specs=pl.BlockSpec((tile, g * D), lambda b: (b, 0)),
        ),
        compiler_params=pltpu.CompilerParams(
            dimension_semantics=("parallel",),   # shard batch across TCs (v7x)
            vmem_limit_bytes=32 * 1024 * 1024,   # ~4x out-tile usage fits easily
        ),
    )(x_folded, s_big, phase)

    # Free unfolds: (folded_pad, g*D) -> (B_pad, D) -> (B, F, 2K); row-major layout
    # already matches torch.cat([cos, sin], -1) per feature.
    return out_flat.reshape(B_pad, D)[:B].reshape(B, F, 2 * K)


def periodic_embeddings_ref(x, frequencies):
    v = 2.0 * math.pi * frequencies[None] * x[..., None]
    return jnp.concatenate([jnp.cos(v), jnp.sin(v)], axis=-1)


if __name__ == "__main__":
    # Module config (small, consistent with the PyTorch __init__)
    n_features = 4
    n_frequencies = 8
    frequency_scale = 0.1

    key = jax.random.PRNGKey(0)
    k_freq, k_x = jax.random.split(key)

    # Deterministic parameter init: frequencies ~ N(0, frequency_scale)
    frequencies = frequency_scale * jax.random.normal(
        k_freq, (n_features, n_frequencies), dtype=jnp.float32)

    # Case 1: small batch
    x = jax.random.normal(k_x, (16, n_features), dtype=jnp.float32)
    out = jax.block_until_ready(periodic_embeddings(x, frequencies))
    ref = periodic_embeddings_ref(x, frequencies)
    assert out.shape == (16, n_features, 2 * n_frequencies)
    assert jnp.allclose(out, ref, atol=1e-5, rtol=1e-5), "mismatch vs reference"

    # Case 2: batch not a multiple of the row-folding factor (padded tail path)
    x2 = jax.random.normal(jax.random.PRNGKey(1), (13, n_features), dtype=jnp.float32)
    out2 = jax.block_until_ready(periodic_embeddings(x2, frequencies))
    ref2 = periodic_embeddings_ref(x2, frequencies)
    assert out2.shape == (13, n_features, 2 * n_frequencies)
    assert jnp.allclose(out2, ref2, atol=1e-5, rtol=1e-5), "mismatch vs reference (tail)"

    # Case 3: enough rows that the heuristic produces >= 2 grid steps
    x3 = jax.random.normal(jax.random.PRNGKey(2), (200, n_features), dtype=jnp.float32)
    out3 = jax.block_until_ready(periodic_embeddings(x3, frequencies))
    ref3 = periodic_embeddings_ref(x3, frequencies)
    assert out3.shape == (200, n_features, 2 * n_frequencies)
    assert jnp.allclose(out3, ref3, atol=1e-5, rtol=1e-5), "mismatch vs reference (multi-tile)"

    print("KERNEL_OK")
</pallas_src>

<mosaic_0001>
module attributes {stable_mosaic.version = 11 : i64} {
  func.func @_periodic_emb_kernel(%arg0: i32, %arg1: memref<8x32xf32, #tpu.memory_space<vmem>>, %arg2: memref<32x512xf32, #tpu.memory_space<vmem>>, %arg3: memref<1x512xf32, #tpu.memory_space<vmem>>, %arg4: memref<8x512xf32, #tpu.memory_space<vmem>>) attributes {dimension_semantics = [#tpu.dimension_semantics<parallel>], iteration_bounds = array<i64: 1>, scalar_prefetch = 0 : i64, scratch_operands = 0 : i64, tpu.core_type = #tpu.core_type<tc>, window_params = [{transform_indices = @transform_0, window_bounds = array<i64: 8, 32>}, {pipeline_mode = #tpu.pipeline_mode<synchronous>, transform_indices = @transform_1, window_bounds = array<i64: 32, 512>}, {pipeline_mode = #tpu.pipeline_mode<synchronous>, transform_indices = @transform_2, window_bounds = array<i64: 1, 512>}, {transform_indices = @transform_3, window_bounds = array<i64: 8, 512>}]} {
    %c0 = arith.constant 0 : index
    %c0_0 = arith.constant 0 : index
    %0 = vector.load %arg1[%c0, %c0_0] : memref<8x32xf32, #tpu.memory_space<vmem>>, vector<8x32xf32>
    %c0_1 = arith.constant 0 : index
    %c0_2 = arith.constant 0 : index
    %1 = vector.load %arg2[%c0_1, %c0_2] : memref<32x512xf32, #tpu.memory_space<vmem>>, vector<32x512xf32>
    %cst = arith.constant dense<0.000000e+00> : vector<8x512xf32>
    %2 = tpu.matmul %0, %1, %cst {dimension_numbers = #tpu.dot_dimension_numbers<[1], [0], [0], [1], [0, 0, 1, 1], [], []>, precision = #tpu.contract_precision<fp32>} : vector<8x32xf32>, vector<32x512xf32>, vector<8x512xf32> -> vector<8x512xf32>
    %c0_3 = arith.constant 0 : index
    %c0_4 = arith.constant 0 : index
    %3 = vector.load %arg3[%c0_3, %c0_4] : memref<1x512xf32, #tpu.memory_space<vmem>>, vector<1x512xf32>
    %4 = vector.broadcast %3 : vector<1x512xf32> to vector<8x512xf32>
    %5 = arith.addf %2, %4 : vector<8x512xf32>
    %6 = math.sin %5 : vector<8x512xf32>
    %c0_5 = arith.constant 0 : index
    %c0_6 = arith.constant 0 : index
    %7 = vector.load %arg4[%c0_5, %c0_6] : memref<8x512xf32, #tpu.memory_space<vmem>>, vector<8x512xf32>
    tpu.vector_store %arg4[%c0_5, %c0_6], %6 {strides = array<i32>} : memref<8x512xf32, #tpu.memory_space<vmem>>, vector<8x512xf32>,
    return
  }
  func.func @transform_0(%arg0: i32) -> (i32, i32) {
    %c0_i32 = arith.constant 0 : i32
    %c0_i32_0 = arith.constant 0 : i32
    return %arg0, %c0_i32 : i32, i32
  }
  func.func @transform_1(%arg0: i32) -> (i32, i32) {
    %c0_i32 = arith.constant 0 : i32
    %c0_i32_0 = arith.constant 0 : i32
    %c0_i32_1 = arith.constant 0 : i32
    return %c0_i32, %c0_i32_0 : i32, i32
  }
  func.func @transform_2(%arg0: i32) -> (i32, i32) {
    %c0_i32 = arith.constant 0 : i32
    %c0_i32_0 = arith.constant 0 : i32
    %c0_i32_1 = arith.constant 0 : i32
    return %c0_i32, %c0_i32_0 : i32, i32
  }
  func.func @transform_3(%arg0: i32) -> (i32, i32) {
    %c0_i32 = arith.constant 0 : i32
    %c0_i32_0 = arith.constant 0 : i32
    return %arg0, %c0_i32 : i32, i32
  }
}

</mosaic_0001>

<bundles_post_ra>
// kernel: tpu_custom_call.1
= control target key start
LH: loop header
LB: loop body
LE: loop exit
PB: predicated region body
PF: predicated region fallthrough
CT: control target
= control target key end

     0   :  { %8 = vsyncpa [#allocation3], 0  ;;  %s2405_s0 = inlined_call_operand.hbm [shape: f32[8,32], index: 0, kind: input, shape index: {}]   ;;  %s2406_s1 = inlined_call_operand.hbm [shape: f32[32,512], index: 1, kind: input, shape index: {}]   ;;  %s2407_s2 = inlined_call_operand.vmem [shape: f32[1,512], index: 2, kind: input, shape index: {}]   ;;  %s2408_s3 = inlined_call_operand.hbm [shape: f32[8,512], index: 3, kind: output, shape index: {}]  }
   0x1   :  { %9 = vsyncpa [#allocation6], 0 }
   0x2   :  { %10 = vsyncpa [#allocation4], 0  ;;  %s1858_s12 = smov [#allocation2]   ;;  %s1859_s14 = smov [#allocation5]  }
   0x3   :  { %s17_s13 = sshll.u32 %s1858_s12, 4  ;;  %s26_s15 = sshll.u32 %s1859_s14, 4  ;;  %s18_s13 = int_to_ptr.vmem [resolvable:$true] %s17_s13  ;;  %s1890_s15 = int_to_ptr.vmem [resolvable:$true] %s26_s15 }
   0x4   :  { %s1786_s18 = scalar_lea.hbm %s2405_s0, 128 }
   0x5   :  { %p1787_p0 = scmp.ne.s32.totalorder %s2405_s0, %s1786_s18  ;;  %p1790_p1 = scmp.lt.u32.totalorder %s1786_s18, %s2405_s0 }
   0x7   :  { %p1792_p2 = pnand %p1790_p1, %p1787_p0 }
   0x9   :  { %1795 = shalt.err (!%p1792_p2)
}
   0xa   :  { %s1796_s23 = scalar_lea.vmem %s18_s13, 128  ;;  %p1801_p4 = scmp.lt.s32.totalorder %s18_s13, %s18_s13 }
   0xb   :  { %p1797_p3 = scmp.ne.s32.totalorder %s18_s13, %s1796_s23  ;;  %p1802_p5 = scmp.lt.s32.totalorder %s1796_s23, %s1796_s23 }
   0xd   :  { %p1803_p6 = por %p1802_p5, %p1801_p4 }
   0xf   :  { %p1804_p7 = pnand %p1803_p6, %p1797_p3 }
  0x11   :  { %1807 = shalt.err (!%p1804_p7)
}
  0x12   :  { %20 = dma.hbm_to_vmem [thread:$0]  %s2405_s0, 128, %s18_s13, [#allocation3]  }
  0x13   :  { %s1808_s28 = scalar_lea.hbm %s2406_s1, 2048 }
  0x14   :  { %p1809_p8 = scmp.ne.s32.totalorder %s2406_s1, %s1808_s28  ;;  %p1812_p9 = scmp.lt.u32.totalorder %s1808_s28, %s2406_s1 }
  0x16   :  { %p1814_p10 = pnand %p1812_p9, %p1809_p8 }
  0x18   :  { %1817 = shalt.err (!%p1814_p10)
}
  0x19   :  { %s1818_s6 = scalar_lea.vmem %s1890_s15, 2048  ;;  %p1823_p12 = scmp.lt.s32.totalorder %s1890_s15, %s1890_s15 }
  0x1a   :  { %p1819_p11 = scmp.ne.s32.totalorder %s1890_s15, %s1818_s6  ;;  %p1824_p13 = scmp.lt.s32.totalorder %s1818_s6, %s1818_s6 }
  0x1c   :  { %p1825_p0 = por %p1824_p13, %p1823_p12 }
  0x1e   :  { %p1826_p1 = pnand %p1825_p0, %p1819_p11 }
  0x20   :  { %1829 = shalt.err (!%p1826_p1)
}
  0x21   :  { %s1860_s0 = smov 512   ;;  %s1861_s7 = smov 32  }
  0x22   :  { %32 = dma.hbm_to_vmem [thread:$0]  %s2406_s1, 2048, %s1890_s15, [#allocation6], %s1860_s0, %s1860_s0, %s1861_s7  }
  0x23   :  { %1852 = dma.done.wait [#allocation3], 128  }
  0x24   :  { %1853 = vsyncadd [#allocation3], 4294967168 }
  0x25   :  { %1854 = dma.done.wait [#allocation6], 2048  }
  0x26   :  { %1855 = vsyncadd [#allocation6], 4294965248  ;;  %v1862_v0 = vmov 0.0   ;;  %v43_v1 = vld [vmem:[#allocation5 + $0x8] sm:$0xff]  ;;  %v45_v3 = vld [vmem:[#allocation5 + $0x18] sm:$0xff]  ;;  %vm80_vm0 = vcmask 261120  }
  0x27   :  { %156 = vmatprep.mubr.f32.mxu0 %v1862_v0  ;;  %699 = vmatprep.mubr.f32.mxu1 %v1862_v0  ;;  %v47_v2 = vld [vmem:[#allocation5 + $0x28] sm:$0xff]  ;;  %v84_v4 = vand.u32 4294901760, %v43_v1  ;;  %v49_v6 = vld [vmem:[#allocation5 + $0x38] sm:$0xff]  ;;  %v627_v7 = vand.u32 4294901760, %v45_v3  ;;  %v42_v8 = vld [vmem:[#allocation5] sm:$0xff] }
  0x28   :  { %v88_v5 = vand.u32 4294901760, %v47_v2  ;;  %v46_v9 = vld [vmem:[#allocation5 + $0x20] sm:$0xff]  ;;  %v631_v10 = vand.u32 4294901760, %v49_v6  ;;  %v86_v11 = vand.u32 4294901760, %v42_v8  ;;  %v44_v13 = vld [vmem:[#allocation5 + $0x10] sm:$0xff]  ;;  %v51_v15 = vld [vmem:[#allocation5 + $0x48] sm:$0xff] }
  0x29   :  { %v90_v12 = vand.u32 4294901760, %v46_v9  ;;  %v48_v14 = vld [vmem:[#allocation5 + $0x30] sm:$0xff]  ;;  %v1925_v17 = vsub.f32 %v43_v1, %v84_v4  ;;  %v1929_v19 = vsub.f32 %v45_v3, %v627_v7  ;;  %v55_v20 = vld [vmem:[#allocation5 + $0x68] sm:$0xff]  ;;  %v53_v21 = vld [vmem:[#allocation5 + $0x58] sm:$0xff]  ;;  %v629_v29 = vand.u32 4294901760, %v44_v13 }
  0x2a   :  { %v1923_v16 = vpack.c.bf16 %v88_v5, %v84_v4  ;;  %v1927_v18 = vsub.f32 %v47_v2, %v88_v5  ;;  %v57_v22 = vld [vmem:[#allocation5 + $0x78] sm:$0xff]  ;;  %v1931_v23 = vpack.c.bf16 %v631_v10, %v627_v7  ;;  %v1933_v24 = vsub.f32 %v49_v6, %v631_v10  ;;  %v50_v27 = vld [vmem:[#allocation5 + $0x40] sm:$0xff]  ;;  %v52_v37 = vld [vmem:[#allocation5 + $0x50] sm:$0xff] }
  0x2b   :  { %v1935_v25 = vpack.c.bf16 %v90_v12, %v86_v11  ;;  %v1937_v26 = vsub.f32 %v42_v8, %v86_v11  ;;  %v1940_v28 = vsub.f32 %v46_v9, %v90_v12  ;;  %v633_v30 = vand.u32 4294901760, %v48_v14  ;;  %v54_v35 = vld [vmem:[#allocation5 + $0x60] sm:$0xff]  ;;  %v56_v42 = vld [vmem:[#allocation5 + $0x70] sm:$0xff]  ;;  %v41_v43 = vld [vmem:[#allocation2] sm:$0xff] }
  0x2c   :  { %1623 = vmatprep.subr.bf16.mxu0 %v1923_v16  ;;  %v92_v31 = vand.u32 4294901760, %v51_v15  ;;  %1671 = vmatprep.subr.bf16.mxu1 %v1931_v23  ;;  %v96_v32 = vand.u32 4294901760, %v55_v20  ;;  %v635_v33 = vand.u32 4294901760, %v53_v21  ;;  %v639_v34 = vand.u32 4294901760, %v57_v22 }
  0x2d   :  { %1625 = vmatpush1.bf16.msra.mxu0 %v1935_v25  ;;  %v94_v36 = vand.u32 4294901760, %v50_v27  ;;  %v1944_v38 = vpack.c.bf16 %v633_v30, %v629_v29  ;;  %v1946_v39 = vsub.f32 %v44_v13, %v629_v29  ;;  %v1948_v40 = vsub.f32 %v48_v14, %v633_v30 }
  0x2e   :  { %v1950_v41 = vsub.f32 %v51_v15, %v92_v31  ;;  %v1952_v44 = vpack.c.bf16 %v96_v32, %v92_v31  ;;  %v1954_v45 = vsub.f32 %v55_v20, %v96_v32  ;;  %v1956_v46 = vpack.c.bf16 %v639_v34, %v635_v33 }
  0x2f   :  { %v1958_v47 = vsub.f32 %v53_v21, %v635_v33  ;;  %1673 = vmatpush1.bf16.msra.mxu1 %v1944_v38  ;;  %v1961_v48 = vsub.f32 %v57_v22, %v639_v34  ;;  %v98_v49 = vand.u32 4294901760, %v54_v35  ;;  %v1963_v50 = vsub.f32 %v50_v27, %v94_v36 }
  0x30   :  { %v637_v51 = vand.u32 4294901760, %v52_v37  ;;  %1627 = vmatprep.subr.bf16.mxu0 %v1952_v44  ;;  %1675 = vmatprep.subr.bf16.mxu1 %v1956_v46  ;;  %v641_v52 = vand.u32 4294901760, %v56_v42  ;;  %v82_v53 = vsel %vm80_vm0, %v41_v43, 0  ;;  %v170_v54 = vand.u32 4294901760, %v1925_v17 }
  0x31   :  { %v182_v55 = vand.u32 4294901760, %v1927_v18  ;;  %v1970_v56 = vpack.c.bf16 %v98_v49, %v94_v36  ;;  %v1972_v57 = vsub.f32 %v54_v35, %v98_v49  ;;  %v1976_v59 = vand.u32 4294901760, %v82_v53 }
  0x32   :  { %v1974_v58 = vsub.f32 %v52_v37, %v637_v51  ;;  %v1978_v60 = vpack.c.bf16 %v641_v52, %v637_v51  ;;  %v1980_v61 = vsub.f32 %v56_v42, %v641_v52  ;;  %v171_v62 = vsub.f32 %v1925_v17, %v170_v54 }
  0x33   :  { %v183_v63 = vsub.f32 %v1927_v18, %v182_v55  ;;  %1629 = vmatpush1.bf16.msra.mxu0 %v1970_v56  ;;  %v1990_v1 = vsub.f32 %v82_v53, %v1976_v59  ;;  %v713_v2 = vand.u32 4294901760, %v1929_v19  ;;  %v725_v3 = vand.u32 4294901760, %v1933_v24 }
  0x34   :  { %v176_v4 = vand.u32 4294901760, %v1937_v26  ;;  %1677 = vmatpush1.bf16.msra.mxu1 %v1978_v60  ;;  %v172_v5 = vand.u32 4294901760, %v171_v62  ;;  %v188_v7 = vand.u32 4294901760, %v1940_v28  ;;  %v719_v8 = vand.u32 4294901760, %v1946_v39 }
  0x35   :  { %v184_v6 = vand.u32 4294901760, %v183_v63  ;;  %v1999_v9 = vand.u32 4294901760, %v1990_v1  ;;  %v714_v10 = vsub.f32 %v1929_v19, %v713_v2  ;;  %v726_v11 = vsub.f32 %v1933_v24, %v725_v3 }
  0x36   :  { %v177_v12 = vsub.f32 %v1937_v26, %v176_v4  ;;  %v189_v14 = vsub.f32 %v1940_v28, %v188_v7  ;;  %v720_v15 = vsub.f32 %v1946_v39, %v719_v8  ;;  %v731_v20 = vand.u32 4294901760, %v1948_v40 }
  0x37   :  { %v1630_v13 = vpack.c.bf16 %v184_v6, %v172_v5  ;;  %v160_v21 = vsub.f32 %v1990_v1, %v1999_v9  ;;  %v715_v22 = vand.u32 4294901760, %v714_v10  ;;  %v727_v27 = vand.u32 4294901760, %v726_v11 }
  0x38   :  { %v178_v29 = vand.u32 4294901760, %v177_v12  ;;  %v190_v30 = vand.u32 4294901760, %v189_v14  ;;  %v721_v31 = vand.u32 4294901760, %v720_v15  ;;  %v732_v32 = vsub.f32 %v1948_v40, %v731_v20 }
  0x39   :  { %1631 = vmatprep.subr.bf16.mxu0 %v1630_v13  ;;  %v194_v33 = vand.u32 4294901760, %v1950_v41  ;;  %v161_v34 = vand.u32 4294901760, %v160_v21  ;;  %v1678_v35 = vpack.c.bf16 %v727_v27, %v715_v22  ;;  %v206_v36 = vand.u32 4294901760, %v1954_v45 }
  0x3a   :  { %v737_v37 = vand.u32 4294901760, %v1958_v47  ;;  %v1632_v42 = vpack.c.bf16 %v190_v30, %v178_v29  ;;  %v733_v43 = vand.u32 4294901760, %v732_v32  ;;  %v749_v51 = vand.u32 4294901760, %v1961_v48 }
  0x3b   :  { %v195_v49 = vsub.f32 %v1950_v41, %v194_v33  ;;  %162 = vmatmul.mubr.f32.vlgmr.msra.gmra.mrb[0].mxu0 %v161_v34  ;;  %705 = vmatmul.mubr.f32.vlgmr.msra.gmra.mrb[0].mxu1 %v161_v34  ;;  %v207_v52 = vsub.f32 %v1954_v45, %v206_v36  ;;  %v200_v62 = vand.u32 4294901760, %v1963_v50  ;;  %v212_v63 = vand.u32 4294901760, %v1972_v57 }
  0x3c   :  { %v738_v53 = vsub.f32 %v1958_v47, %v737_v37  ;;  %1679 = vmatprep.subr.bf16.mxu1 %v1678_v35  ;;  %1633 = vmatpush1.bf16.msra.mxu0 %v1632_v42  ;;  %v1680_v5 = vpack.c.bf16 %v733_v43, %v721_v31  ;;  %v750_v10 = vsub.f32 %v1961_v48, %v749_v51  ;;  %v743_v11 = vand.u32 4294901760, %v1974_v58 }
  0x3d   :  { %v196_v6 = vand.u32 4294901760, %v195_v49  ;;  %v208_v12 = vand.u32 4294901760, %v207_v52  ;;  %v201_v14 = vsub.f32 %v1963_v50, %v200_v62  ;;  %v213_v15 = vsub.f32 %v1972_v57, %v212_v63  ;;  %272 = vmatprep.mubr.f32.mxu0 %v1862_v0  ;;  %815 = vmatprep.mubr.f32.mxu1 %v1862_v0 }
  0x3e   :  { %v739_v13 = vand.u32 4294901760, %v738_v53  ;;  %1681 = vmatpush1.bf16.msra.mxu1 %v1680_v5  ;;  %v751_v21 = vand.u32 4294901760, %v750_v10  ;;  %v744_v22 = vsub.f32 %v1974_v58, %v743_v11  ;;  %v755_v27 = vand.u32 4294901760, %v1980_v61 }
  0x3f   :  { %v1634_v29 = vpack.c.bf16 %v208_v12, %v196_v6  ;;  %v202_v30 = vand.u32 4294901760, %v201_v14  ;;  %v214_v31 = vand.u32 4294901760, %v213_v15  ;;  %v1638_v42 = vpack.c.bf16 %v1927_v18, %v1925_v17 }
  0x40   :  { %v1682_v32 = vpack.c.bf16 %v751_v21, %v739_v13  ;;  %v745_v34 = vand.u32 4294901760, %v744_v22  ;;  %v756_v35 = vsub.f32 %v1980_v61, %v755_v27  ;;  %v1686_v52 = vpack.c.bf16 %v1933_v24, %v1929_v19 }
  0x41   :  { %1635 = vmatprep.subr.bf16.mxu0 %v1634_v29  ;;  %v1636_v43 = vpack.c.bf16 %v214_v31, %v202_v30  ;;  %v1640_v53 = vpack.c.bf16 %v1940_v28, %v1937_v26  ;;  %v1642_v6 = vpack.c.bf16 %v1954_v45, %v1950_v41  ;;  %v1688_v10 = vpack.c.bf16 %v1948_v40, %v1946_v39  ;;  %v58_v39 = vld [vmem:[%s2407_s2] sm:$0xf]  ;;  %s1869_s2 = smov [#allocation7]  }
  0x42   :  { %1683 = vmatprep.subr.bf16.mxu1 %v1682_v32  ;;  %v757_v49 = vand.u32 4294901760, %v756_v35  ;;  %v1690_v12 = vpack.c.bf16 %v1961_v48, %v1958_v47  ;;  %v1644_v13 = vpack.c.bf16 %v1972_v57, %v1963_v50  ;;  %v1692_v14 = vpack.c.bf16 %v1980_v61, %v1974_v58  ;;  %s1596_s11 = sshll.u32 %s1869_s2, 4  ;;  %s1597_s11 = int_to_ptr.vmem [resolvable:$true] %s1596_s11 }
  0x43   :  { %1637 = vmatpush1.bf16.msra.mxu0 %v1636_v43  ;;  %v1654_v61 = vpack.c.bf16 %v182_v55, %v170_v54  ;;  %v1702_v15 = vpack.c.bf16 %v725_v3, %v713_v2  ;;  %v1656_v17 = vpack.c.bf16 %v188_v7, %v176_v4  ;;  %v1658_v18 = vpack.c.bf16 %v206_v36, %v194_v33  ;;  %s1830_s12 = scalar_lea.vmem %s1597_s11, 512  ;;  %p1835_p3 = scmp.lt.s32.totalorder %s1597_s11, %s1597_s11 }
  0x44   :  { %v1684_v5 = vpack.c.bf16 %v757_v49, %v745_v34  ;;  %1639 = vmatprep.subr.bf16.mxu0 %v1638_v42  ;;  %v1704_v19 = vpack.c.bf16 %v731_v20, %v719_v8  ;;  %v1706_v24 = vpack.c.bf16 %v749_v51, %v737_v37  ;;  %v1660_v26 = vpack.c.bf16 %v212_v63, %v200_v62  ;;  %p1831_p2 = scmp.ne.s32.totalorder %s1597_s11, %s1830_s12  ;;  %p1836_p4 = scmp.lt.s32.totalorder %s1830_s12, %s1830_s12 }
  0x45   :  { %v1708_v28 = vpack.c.bf16 %v755_v27, %v743_v11  ;;  %v1863_v49 = vmov 683565275  }
  0x46   :  { %1685 = vmatpush1.bf16.msra.mxu1 %v1684_v5  ;;  %274 = vmatmul.mubr.f32.vlgmr.msra.gmra.mrb[0].mxu0 %v1976_v59  ;;  %p1837_p5 = por %p1836_p4, %p1835_p3 }
  0x47   :  { %1687 = vmatprep.subr.bf16.mxu1 %v1686_v52  ;;  %1641 = vmatpush1.bf16.msra.mxu0 %v1640_v53  ;;  %v1864_v53 = vmov 2475754826  }
  0x48   :  { %1643 = vmatprep.subr.bf16.mxu0 %v1642_v6  ;;  %360 = vmatprep.mubr.f32.mxu0 %v1862_v0  ;;  %v1865_v6 = vmov 2131351028   ;;  %p1838_p6 = pnand %p1837_p5, %p1831_p2 }
  0x49   :  { %817 = vmatmul.mubr.f32.vlgmr.msra.gmra.mrb[0].mxu1 %v1976_v59 }
  0x4a   :  { %1689 = vmatpush1.bf16.msra.mxu1 %v1688_v10  ;;  %903 = vmatprep.mubr.f32.mxu1 %v1862_v0 }
  0x4b   :  { %1691 = vmatprep.subr.bf16.mxu1 %v1690_v12  ;;  %1645 = vmatpush1.bf16.msra.mxu0 %v1644_v13  ;;  %v1866_v12 = vmov 2102212464  }
  0x4c   :  { %1647 = vmatprep.subr.bf16.mxu0 %v1923_v16 }
  0x4e   :  { %1693 = vmatpush1.bf16.msra.mxu1 %v1692_v14  ;;  %363 = vmatmul.mubr.f32.vlgmr.msra.gmra.mrb[0].mxu0 %v1990_v1  ;;  %v1867_v14 = vmov 920167782  }
  0x4f   :  { %1695 = vmatprep.subr.bf16.mxu1 %v1931_v23  ;;  %1649 = vmatpush1.bf16.msra.mxu0 %v1935_v25 }
  0x50   :  { %1651 = vmatprep.subr.bf16.mxu0 %v1952_v44  ;;  %441 = vmatprep.mubr.f32.mxu0 %v1862_v0 }
  0x51   :  { %906 = vmatmul.mubr.f32.vlgmr.msra.gmra.mrb[0].mxu1 %v1990_v1 }
  0x52   :  { %1697 = vmatpush1.bf16.msra.mxu1 %v1944_v38  ;;  %984 = vmatprep.mubr.f32.mxu1 %v1862_v0 }
  0x53   :  { %1699 = vmatprep.subr.bf16.mxu1 %v1956_v46  ;;  %1653 = vmatpush1.bf16.msra.mxu0 %v1970_v56 }
  0x54   :  { %1655 = vmatprep.subr.bf16.mxu0 %v1654_v61 }
  0x56   :  { %1701 = vmatpush1.bf16.msra.mxu1 %v1978_v60  ;;  %445 = vmatmul.mubr.f32.vlgmr.msra.gmra.mrb[0].mxu0 %v1999_v9 }
  0x57   :  { %1703 = vmatprep.subr.bf16.mxu1 %v1702_v15  ;;  %1657 = vmatpush1.bf16.msra.mxu0 %v1656_v17 }
  0x58   :  { %1659 = vmatprep.subr.bf16.mxu0 %v1658_v18  ;;  %539 = vmatprep.mubr.f32.mxu0 %v1862_v0 }
  0x59   :  { %988 = vmatmul.mubr.f32.vlgmr.msra.gmra.mrb[0].mxu1 %v1999_v9 }
  0x5a   :  { %1705 = vmatpush1.bf16.msra.mxu1 %v1704_v19  ;;  %1082 = vmatprep.mubr.f32.mxu1 %v1862_v0 }
  0x5b   :  { %1707 = vmatprep.subr.bf16.mxu1 %v1706_v24  ;;  %1661 = vmatpush1.bf16.msra.mxu0 %v1660_v26  ;;  %v1868_v26 = vmov 1326507024  }
  0x5c   :  { %1663 = vmatprep.subr.bf16.mxu0 %v1923_v16  ;;  %v60_v16 = vlaneseq }
  0x5e   :  { %1709 = vmatpush1.bf16.msra.mxu1 %v1708_v28  ;;  %541 = vmatmul.mubr.f32.vlgmr.msra.gmra.mrb[0].mxu0 %v1976_v59 }
  0x5f   :  { %1711 = vmatprep.subr.bf16.mxu1 %v1931_v23  ;;  %1665 = vmatpush1.bf16.msra.mxu0 %v1935_v25  ;;  %v61_v23 = vshrl.u32 %v60_v16, 7 }
  0x60   :  { %1667 = vmatprep.subr.bf16.mxu0 %v1952_v44  ;;  %619 = vmatprep.mubr.f32.mxu0 %v1862_v0 }
  0x61   :  { %1084 = vmatmul.mubr.f32.vlgmr.msra.gmra.mrb[0].mxu1 %v1976_v59  ;;  %v62_v25 = vsub.s32 0, %v61_v23  ;;  %v70_v40 = vsub.s32 2, %v61_v23  ;;  %v74_v50 = vsub.s32 3, %v61_v23 }
  0x62   :  { %1713 = vmatpush1.bf16.msra.mxu1 %v1944_v38  ;;  %1162 = vmatprep.mubr.f32.mxu1 %v1862_v0  ;;  %v66_v38 = vsub.s32 1, %v61_v23 }
  0x63   :  { %1715 = vmatprep.subr.bf16.mxu1 %v1956_v46  ;;  %1669 = vmatpush1.bf16.msra.mxu0 %v1970_v56  ;;  %v63_v0 = vrot.slane %v58_v39, %v62_v25  ;;  %v71_v45 = vrot.slane %v58_v39, %v70_v40  ;;  %v75_v7 = vrot.slane %v58_v39, %v74_v50 }
  0x64   :  { %v67_v41 = vrot.slane %v58_v39, %v66_v38 }
  0x66   :  { %1717 = vmatpush1.bf16.msra.mxu1 %v1978_v60  ;;  %621 = vmatmul.mubr.f32.vlgmr.msra.gmra.mrb[0].mxu0 %v1976_v59 }
  0x69   :  { %1164 = vmatmul.mubr.f32.vlgmr.msra.gmra.mrb[0].mxu1 %v1976_v59 }
 0x139   :  { %v622_v44 = vpop.f32.mrb[0].mxu0 }
 0x13a   :  { %v2137_v46 = vadd.f32 %v622_v44, %v63_v0  ;;  %v624_v47 = vpop.f32.mrb[1].mxu0 }
 0x13b   :  { %v2139_v48 = vadd.f32 %v624_v47, %v67_v41 }
 0x13c   :  { %v1170_v54 = vand.u32 2147483647, %v2137_v46  ;;  %v1173_v55 = vand.u32 2139095040, %v2137_v46  ;;  %v1165_v56 = vpop.f32.mrb[0].mxu1  ;;  %vm1172_vm13 = vcmp.lt.s32.totalorder %v2137_v46, 0 }
 0x13d   :  { %v2143_v57 = vadd.f32 %v1165_v56, %v71_v45  ;;  %v1277_v58 = vand.u32 2139095040, %v2139_v48  ;;  %v1167_v59 = vpop.f32.mrb[1].mxu1  ;;  %v1274_v4 = vand.u32 2147483647, %v2139_v48 }
 0x13e   :  { %v1174_v60 = vshrl.u32 %v1173_v55, 23  ;;  %v1177_v1 = vand.u32 8388607, %v1170_v54  ;;  %v2157_v21 = vadd.f32 %v1167_v59, %v75_v7  ;;  %vm2229_vm14 = vcmp.le.f32.partialorder %v1170_v54, 0.7853982 }
 0x13f   :  { %v1378_v2 = vand.u32 2147483647, %v2143_v57  ;;  %v1381_v3 = vand.u32 2139095040, %v2143_v57  ;;  %v1278_v9 = vshrl.u32 %v1277_v58, 23  ;;  %v2155_v11 = vand.u32 8388607, %v1274_v4 }
 0x140   :  { %v1606_v8 = vadd.s32 4294967169, %v1174_v60  ;;  %v1178_v36 = vor.u32 8388608, %v1177_v1  ;;  %v1485_v42 = vand.u32 2139095040, %v2157_v21 }
 0x141   :  { %v1382_v20 = vshrl.u32 %v1381_v3, 23  ;;  %v1385_v33 = vand.u32 8388607, %v1378_v2  ;;  %v1610_v51 = vadd.s32 4294967169, %v1278_v9  ;;  %v1282_v35 = vor.u32 8388608, %v2155_v11 }
 0x142   :  { %v1180_v37 = vadd.s32 1, %v1606_v8  ;;  %v2159_v32 = vshll.u32 %v1178_v36, 8 }
 0x143   :  { %v1614_v62 = vadd.s32 4294967169, %v1382_v20  ;;  %v1386_v63 = vor.u32 8388608, %v1385_v33  ;;  %v1284_v22 = vadd.s32 1, %v1610_v51 }
 0x144   :  { %vm1181_vm1 = vcmp.gt.s32.totalorder %v1180_v37, 0 }
 0x145   :  { %v1182_v27 = vsel %vm1181_vm1, %v1180_v37, 0  ;;  %v1388_v29 = vadd.s32 1, %v1614_v62  ;;  %v2161_v34 = vshll.u32 %v1386_v63, 8  ;;  %vm1285_vm2 = vcmp.gt.s32.totalorder %v1284_v22, 0 }
 0x146   :  { %v1183_v30 = vshrl.u32 %v1182_v27, 5  ;;  %v1184_v31 = vand.u32 31, %v1182_v27  ;;  %v1286_v3 = vsel %vm1285_vm2, %v1284_v22, 0  ;;  %vm1380_vm1 = vcmp.lt.s32.totalorder %v2143_v57, 0 }
 0x147   :  { %vm1389_vm3 = vcmp.gt.s32.totalorder %v1388_v29, 0 }
 0x148   :  { %v1185_v43 = vsub.s32 32, %v1184_v31  ;;  %v1187_v52 = vshll.u32 %v1863_v49, %v1184_v31  ;;  %v1190_v5 = vshll.u32 %v1864_v53, %v1184_v31  ;;  %v1193_v10 = vshll.u32 %v1865_v6, %v1184_v31 }
 0x149   :  { %v1196_v13 = vshll.u32 %v1866_v12, %v1184_v31  ;;  %v1199_v61 = vshll.u32 %v1867_v14, %v1184_v31  ;;  %vm1202_vm4 = vcmp.lt.s32.totalorder %v1183_v30, 1  ;;  %vm1203_vm5 = vcmp.lt.s32.totalorder %v1183_v30, 2 }
 0x14a   :  { %v1188_v15 = vshrl.u32 %v1864_v53, %v1185_v43  ;;  %v1191_v17 = vshrl.u32 %v1865_v6, %v1185_v43  ;;  %v1194_v18 = vshrl.u32 %v1866_v12, %v1185_v43  ;;  %v1186_v19 = vshrl.u32 %v1863_v49, %v1185_v43 }
 0x14b   :  { %v1197_v24 = vshrl.u32 %v1867_v14, %v1185_v43  ;;  %v1200_v28 = vshrl.u32 %v1868_v26, %v1185_v43  ;;  %vm1204_vm6 = vcmp.lt.s32.totalorder %v1183_v30, 3  ;;  %v1390_v39 = vsel %vm1389_vm3, %v1388_v29, 0 }
 0x14c   :  { %v1189_v16 = vor.u32 %v1188_v15, %v1187_v52  ;;  %v1192_v23 = vor.u32 %v1191_v17, %v1190_v5  ;;  %v1195_v25 = vor.u32 %v1194_v18, %v1193_v10  ;;  %vm1205_vm7 = vcmp.lt.s32.totalorder %v1183_v30, 4 }
 0x14d   :  { %v1198_v38 = vor.u32 %v1197_v24, %v1196_v13  ;;  %v1201_v40 = vor.u32 %v1200_v28, %v1199_v61  ;;  %v1392_v0 = vand.u32 31, %v1390_v39  ;;  %v1391_v9 = vshrl.u32 %v1390_v39, 5 }
 0x14e   :  { %v1206_v41 = vsel %vm1202_vm4, %v1186_v19, %v1189_v16  ;;  %v1207_v44 = vsel %vm1205_vm7, %v1195_v25, 2102212464  ;;  %v1210_v45 = vsel %vm1202_vm4, %v1189_v16, %v1192_v23  ;;  %v1214_v47 = vsel %vm1202_vm4, %v1192_v23, %v1195_v25 }
 0x14f   :  { %v1208_v50 = vsel %vm1204_vm6, %v1192_v23, %v1207_v44  ;;  %v1211_v55 = vsel %vm1205_vm7, %v1198_v38, 920167782  ;;  %v1215_v56 = vsel %vm1205_vm7, %v1201_v40, 1326507024  ;;  %v1393_v58 = vsub.s32 32, %v1392_v0 }
 0x150   :  { %v1209_v59 = vsel %vm1203_vm5, %v1206_v41, %v1208_v50  ;;  %v1212_v60 = vsel %vm1204_vm6, %v1195_v25, %v1211_v55  ;;  %v1216_v1 = vsel %vm1204_vm6, %v1198_v38, %v1215_v56  ;;  %v1395_v20 = vshll.u32 %v1863_v49, %v1392_v0 }
 0x151   :  { %v1213_v7 = vsel %vm1203_vm5, %v1210_v45, %v1212_v60  ;;  %v1217_v8 = vsel %vm1203_vm5, %v1214_v47, %v1216_v1  ;;  %v1225_v62 = vmul.u32 %v2159_v32, %v1209_v59  ;;  %v1396_v63 = vshrl.u32 %v1864_v53, %v1393_v58 }
 0x152   :  { %v2189_v33 = vmul.u32.u64.low %v2159_v32, %v1217_v8  ;;  %v2190_v36 = vmul.u32.u64.high %v2159_v32, %v1217_v8, %v2189_v33  ;;  %v2193_v37 = vmul.u32.u64.low %v2159_v32, %v1213_v7  ;;  %v2194_v51 = vmul.u32.u64.high %v2159_v32, %v1213_v7, %v2193_v37 }
 0x153   :  { %v1398_v22 = vshll.u32 %v1864_v53, %v1392_v0  ;;  %v1399_v27 = vshrl.u32 %v1865_v6, %v1393_v58  ;;  %v1401_v29 = vshll.u32 %v1865_v6, %v1392_v0  ;;  %v1402_v30 = vshrl.u32 %v1866_v12, %v1393_v58 }
 0x154   :  { %v1404_v31 = vshll.u32 %v1866_v12, %v1392_v0  ;;  %v1405_v43 = vshrl.u32 %v1867_v14, %v1393_v58  ;;  %v1397_v52 = vor.u32 %v1396_v63, %v1395_v20  ;;  %v1407_v10 = vshll.u32 %v1867_v14, %v1392_v0 }
 0x155   :  { %v1400_v5 = vor.u32 %v1399_v27, %v1398_v22  ;;  %v1408_v32 = vshrl.u32 %v1868_v26, %v1393_v58  ;;  %vm1227_vm8 = vc.u32 %v2190_v36, %v2193_v37  ;;  %v1228_v13 = vadd.s32 1, %v2194_v51 }
 0x156   :  { %v1394_v61 = vshrl.u32 %v1863_v49, %v1393_v58  ;;  %v1403_v15 = vor.u32 %v1402_v30, %v1401_v29  ;;  %v1406_v17 = vor.u32 %v1405_v43, %v1404_v31  ;;  %vm1410_vm9 = vcmp.lt.s32.totalorder %v1391_v9, 1 }
 0x157   :  { %v1409_v18 = vor.u32 %v1408_v32, %v1407_v10  ;;  %vm1412_vm10 = vcmp.lt.s32.totalorder %v1391_v9, 3  ;;  %v1229_v19 = vsel %vm1227_vm8, %v1228_v13, %v2194_v51  ;;  %vm1413_vm11 = vcmp.lt.s32.totalorder %v1391_v9, 4 }
 0x158   :  { %v1414_v24 = vsel %vm1410_vm9, %v1394_v61, %v1397_v52  ;;  %v1418_v28 = vsel %vm1410_vm9, %v1397_v52, %v1400_v5  ;;  %v1230_v16 = vadd.s32 %v1229_v19, %v1225_v62  ;;  %v1415_v23 = vsel %vm1413_vm11, %v1403_v15, 2102212464 }
 0x159   :  { %v1419_v25 = vsel %vm1413_vm11, %v1406_v17, 920167782  ;;  %v1422_v39 = vsel %vm1410_vm9, %v1400_v5, %v1403_v15  ;;  %vm1411_vm12 = vcmp.lt.s32.totalorder %v1391_v9, 2  ;;  %v1416_v38 = vsel %vm1412_vm10, %v1400_v5, %v1415_v23 }
 0x15a   :  { %v1420_v40 = vsel %vm1412_vm10, %v1403_v15, %v1419_v25  ;;  %v1423_v0 = vsel %vm1413_vm11, %v1409_v18, 1326507024  ;;  %v1231_v41 = vadd.s32 536870912, %v1230_v16  ;;  %v2210_v47 = vshrl.u32 %v1286_v3, 5 }
 0x15b   :  { %v1421_v44 = vsel %vm1411_vm12, %v1418_v28, %v1420_v40  ;;  %v1424_v45 = vsel %vm1412_vm10, %v1406_v17, %v1423_v0  ;;  %v1417_v50 = vsel %vm1411_vm12, %v1414_v24, %v1416_v38  ;;  %v1288_v7 = vand.u32 31, %v1286_v3 }
 0x15c   :  { %v1425_v55 = vsel %vm1411_vm12, %v1422_v39, %v1424_v45  ;;  %v2213_v56 = vmul.u32.u64.low %v2161_v34, %v1421_v44  ;;  %v2214_v58 = vmul.u32.u64.high %v2161_v34, %v1421_v44, %v2213_v56  ;;  %v1232_v59 = vshrl.u32 %v1231_v41, 30 }
 0x15d   :  { %v2218_v60 = vmul.u32.u64.low %v2161_v34, %v1425_v55  ;;  %v2219_v1 = vmul.u32.u64.high %v2161_v34, %v1425_v55, %v2218_v60  ;;  %v1289_v9 = vsub.s32 32, %v1288_v7  ;;  %v2224_v20 = vshll.u32 %v1282_v35, 8 }
 0x15e   :  { %v1233_v8 = vshll.u32 %v1232_v59, 30  ;;  %v1482_v33 = vand.u32 2147483647, %v2157_v21  ;;  %v1226_v62 = vadd.s32 %v2193_v37, %v2190_v36  ;;  %v1433_v3 = vmul.u32 %v2161_v34, %v1417_v50 }
 0x15f   :  { %v1436_v63 = vadd.s32 1, %v2214_v58  ;;  %v1486_v22 = vshrl.u32 %v1485_v42, 23  ;;  %v1256_v35 = vsub.s32 4, %v1232_v59  ;;  %vm1435_vm15 = vc.u32 %v2219_v1, %v2213_v56 }
 0x160   :  { %v2238_v11 = vsub.s32 %v1230_v16, %v1233_v8  ;;  %vm1306_vm0 = vcmp.lt.s32.totalorder %v2210_v47, 1  ;;  %v1291_v27 = vshll.u32 %v1863_v49, %v1288_v7  ;;  %v1292_v36 = vshrl.u32 %v1864_v53, %v1289_v9 }
 0x161   :  { %v1437_v54 = vsel %vm1435_vm15, %v1436_v63, %v2214_v58  ;;  %v1294_v34 = vshll.u32 %v1864_v53, %v1288_v7  ;;  %v1295_v42 = vshrl.u32 %v1865_v6, %v1289_v9  ;;  %v1297_v30 = vshll.u32 %v1865_v6, %v1288_v7 }
 0x162   :  { %v1236_v37 = vsub.s32 0, %v2238_v11  ;;  %v1438_v29 = vadd.s32 %v1437_v54, %v1433_v3  ;;  %v1293_v31 = vor.u32 %v1292_v36, %v1291_v27  ;;  %v1298_v43 = vshrl.u32 %v1866_v12, %v1289_v9 }
 0x163   :  { %v1300_v52 = vshll.u32 %v1866_v12, %v1288_v7  ;;  %v1301_v5 = vshrl.u32 %v1867_v14, %v1289_v9  ;;  %v1257_v32 = vsel %vm1172_vm13, %v1256_v35, %v1232_v59  ;;  %v1296_v61 = vor.u32 %v1295_v42, %v1294_v34 }
 0x164   :  { %v1607_v10 = vmin.u32 %v1236_v37, %v2238_v11  ;;  %v1439_v13 = vadd.s32 536870912, %v1438_v29  ;;  %v1299_v15 = vor.u32 %v1298_v43, %v1297_v30  ;;  %v1303_v18 = vshll.u32 %v1867_v14, %v1288_v7 }
 0x165   :  { %v1302_v17 = vor.u32 %v1301_v5, %v1300_v52  ;;  %v1304_v19 = vshrl.u32 %v1868_v26, %v1289_v9  ;;  %vm1307_vm2 = vcmp.lt.s32.totalorder %v2210_v47, 2  ;;  %vm1309_vm3 = vcmp.lt.s32.totalorder %v2210_v47, 4 }
 0x166   :  { %v1238_v24 = vclz %v1607_v10  ;;  %v1440_v28 = vshrl.u32 %v1439_v13, 30  ;;  %vm1308_vm4 = vcmp.lt.s32.totalorder %v2210_v47, 3  ;;  %v1314_v23 = vsel %vm1306_vm0, %v1293_v31, %v1296_v61 }
 0x167   :  { %v1305_v16 = vor.u32 %v1304_v19, %v1303_v18  ;;  %v1315_v25 = vsel %vm1309_vm3, %v1302_v17, 920167782  ;;  %v1259_v38 = vsel %vm2229_vm14, 0, %v1257_v32  ;;  %v1290_v0 = vshrl.u32 %v1863_v49, %v1289_v9 }
 0x168   :  { %v1608_v39 = vadd.s32 4294967294, %v1238_v24  ;;  %v1441_v40 = vshll.u32 %v1440_v28, 30  ;;  %v1311_v41 = vsel %vm1309_vm3, %v1299_v15, 2102212464  ;;  %v1316_v44 = vsel %vm1308_vm4, %v1299_v15, %v1315_v25 }
 0x169   :  { %v1319_v45 = vsel %vm1309_vm3, %v1305_v16, 1326507024  ;;  %v1618_v50 = vadd.s32 4294967169, %v1486_v22  ;;  %v1317_v58 = vsel %vm1307_vm2, %v1314_v23, %v1316_v44  ;;  %v1318_v59 = vsel %vm1306_vm0, %v1296_v61, %v1299_v15 }
 0x16a   :  { %vm1609_vm5 = vcmp.lt.s32.totalorder %v1608_v39, 0  ;;  %v2269_v55 = vsub.s32 %v1438_v29, %v1441_v40  ;;  %v1464_v7 = vsub.s32 4, %v1440_v28  ;;  %v1310_v8 = vsel %vm1306_vm0, %v1290_v0, %v1293_v31 }
 0x16b   :  { %v1241_v60 = vsel %vm1609_vm5, 0, %v1608_v39  ;;  %v1320_v9 = vsel %vm1308_vm4, %v1302_v17, %v1319_v45  ;;  %v1312_v35 = vsel %vm1308_vm4, %v1296_v61, %v1311_v41  ;;  %v1492_v30 = vadd.s32 1, %v1618_v50 }
 0x16c   :  { %v1242_v3 = vsub.s32 32, %v1241_v60  ;;  %v1246_v63 = vsub.s32 4294967266, %v1241_v60  ;;  %v1444_v22 = vsub.s32 0, %v2269_v55  ;;  %v1243_v54 = vshll.u32 %v2238_v11, %v1241_v60 }
 0x16d   :  { %v1321_v27 = vsel %vm1307_vm2, %v1318_v59, %v1320_v9  ;;  %v2286_v36 = vmul.u32.u64.low %v2224_v20, %v1317_v58  ;;  %v2287_v34 = vmul.u32.u64.high %v2224_v20, %v1317_v58, %v2286_v36  ;;  %v1465_v31 = vsel %vm1380_vm1, %v1464_v7, %v1440_v28 }
 0x16e   :  { %v1244_v37 = vshrl.u32 %v1226_v62, %v1242_v3  ;;  %v1247_v29 = vadd.s32 127, %v1246_v63  ;;  %v1615_v42 = vmin.u32 %v1444_v22, %v2269_v55  ;;  %v1313_v43 = vsel %vm1307_vm2, %v1310_v8, %v1312_v35 }
 0x16f   :  { %v2296_v11 = vmul.u32.u64.low %v2224_v20, %v1321_v27  ;;  %v2297_v52 = vmul.u32.u64.high %v2224_v20, %v1321_v27, %v2296_v11  ;;  %vm1493_vm6 = vcmp.gt.s32.totalorder %v1492_v30, 0  ;;  %v1263_v13 = vadd.s32 3, %v1259_v38 }
 0x170   :  { %v1245_v5 = vor.u32 %v1244_v37, %v1243_v54  ;;  %v1248_v10 = vshll.u32 %v1247_v29, 23  ;;  %v1446_v32 = vclz %v1615_v42  ;;  %vm2301_vm7 = vcmp.le.f32.partialorder %v1378_v2, 0.7853982 }
 0x171   :  { %v1332_v61 = vadd.s32 1, %v2287_v34  ;;  %v1494_v15 = vsel %vm1493_vm6, %v1492_v30, 0  ;;  %v1434_v17 = vadd.s32 %v2213_v56, %v2219_v1  ;;  %v1489_v19 = vand.u32 8388607, %v1482_v33 }
 0x172   :  { %v1249_v47 = vor.u32 4788187, %v1248_v10  ;;  %v1616_v18 = vadd.s32 4294967294, %v1446_v32  ;;  %v1467_v24 = vsel %vm2301_vm7, 0, %v1465_v31  ;;  %v1329_v28 = vmul.u32 %v2224_v20, %v1313_v43 }
 0x173   :  { %vm1331_vm8 = vc.u32 %v2297_v52, %v2286_v36  ;;  %v1496_v2 = vand.u32 31, %v1494_v15  ;;  %v1252_v23 = vcvt.s32.f32 %v1245_v5  ;;  %v2316_v39 = vand.u32 3, %v1263_v13 }
 0x174   :  { %v1250_v16 = vand.u32 2147483647, %v1249_v47  ;;  %vm1617_vm9 = vcmp.lt.s32.totalorder %v1616_v18, 0  ;;  %v1333_v25 = vsel %vm1331_vm8, %v1332_v61, %v2287_v34  ;;  %v1490_v44 = vor.u32 8388608, %v1489_v19 }
 0x175   :  { %v1449_v56 = vsel %vm1617_vm9, 0, %v1616_v18  ;;  %v1334_v1 = vadd.s32 %v1333_v25, %v1329_v28  ;;  %v1497_v38 = vsub.s32 32, %v1496_v2  ;;  %v2319_v45 = vadd.s32 3, %v1467_v24 }
 0x176   :  { %v1253_v40 = vmul.f32 %v1252_v23, %v1250_v16  ;;  %v1450_v0 = vsub.s32 32, %v1449_v56  ;;  %v1454_v41 = vsub.s32 4294967266, %v1449_v56  ;;  %v1451_v20 = vshll.u32 %v2269_v55, %v1449_v56 }
 0x177   :  { %v1335_v50 = vadd.s32 536870912, %v1334_v1  ;;  %v1500_v58 = vshrl.u32 %v1864_v53, %v1497_v38  ;;  %v1503_v8 = vshrl.u32 %v1865_v6, %v1497_v38  ;;  %v1499_v3 = vshll.u32 %v1863_v49, %v1496_v2 }
 0x178   :  { %v1254_v59 = vxor.u32 2147483648, %v1253_v40  ;;  %v1452_v60 = vshrl.u32 %v1434_v17, %v1450_v0  ;;  %v1455_v7 = vadd.s32 127, %v1454_v41  ;;  %v1502_v63 = vshll.u32 %v1864_v53, %v1496_v2 }
 0x179   :  { %v2323_v9 = vshrl.u32 %v1335_v50, 30  ;;  %v1506_v22 = vshrl.u32 %v1866_v12, %v1497_v38  ;;  %v1505_v27 = vshll.u32 %v1865_v6, %v1496_v2  ;;  %v1495_v29 = vshrl.u32 %v1494_v15, 5 }
 0x17a   :  { %v1255_v55 = vsel %vm1172_vm13, %v1254_v59, %v1253_v40  ;;  %v1453_v35 = vor.u32 %v1452_v60, %v1451_v20  ;;  %v1456_v54 = vshll.u32 %v1455_v7, 23  ;;  %v1501_v42 = vor.u32 %v1500_v58, %v1499_v3 }
 0x17b   :  { %v1258_v34 = vsel %vm2229_vm14, %v2137_v46, %v1255_v55  ;;  %v1337_v37 = vshll.u32 %v2323_v9, 30  ;;  %v1504_v53 = vor.u32 %v1503_v8, %v1502_v63  ;;  %v1507_v31 = vor.u32 %v1506_v22, %v1505_v27 }
 0x17c   :  { %1770 = vcosq.f32 %v1258_v34  ;;  %v1457_v30 = vor.u32 4788187, %v1456_v54  ;;  %v1508_v11 = vshll.u32 %v1866_v12, %v1496_v2  ;;  %v1509_v5 = vshrl.u32 %v1867_v14, %v1497_v38 }
 0x17d   :  { %1772 = vsinq.f32 %v1258_v34  ;;  %v2335_v43 = vsub.s32 %v1334_v1, %v1337_v37  ;;  %v1460_v10 = vcvt.s32.f32 %v1453_v35  ;;  %v1511_v51 = vshll.u32 %v1867_v14, %v1496_v2 }
 0x17e   :  { %v1458_v6 = vand.u32 2147483647, %v1457_v30  ;;  %v1512_v32 = vshrl.u32 %v1868_v26, %v1497_v38  ;;  %v1498_v61 = vshrl.u32 %v1863_v49, %v1497_v38  ;;  %v1510_v15 = vor.u32 %v1509_v5, %v1508_v11 }
 0x17f   :  { %v1340_v13 = vsub.s32 0, %v2335_v43  ;;  %v1530_v47 = vshll.u32 %v1490_v44, 8  ;;  %vm1514_vm10 = vcmp.lt.s32.totalorder %v1495_v29, 1  ;;  %vm1517_vm11 = vcmp.lt.s32.totalorder %v1495_v29, 4 }
 0x180   :  { %v1461_v17 = vmul.f32 %v1460_v10, %v1458_v6  ;;  %v1513_v18 = vor.u32 %v1512_v32, %v1511_v51  ;;  %vm1516_vm12 = vcmp.lt.s32.totalorder %v1495_v29, 3  ;;  %v1518_v19 = vsel %vm1514_vm10, %v1498_v61, %v1501_v42 }
 0x181   :  { %v1611_v12 = vmin.u32 %v1340_v13, %v2335_v43  ;;  %v1519_v24 = vsel %vm1517_vm11, %v1507_v31, 2102212464  ;;  %v1522_v2 = vsel %vm1514_vm10, %v1501_v42, %v1504_v53  ;;  %v1523_v26 = vsel %vm1517_vm11, %v1510_v15, 920167782 }
 0x182   :  { %v1462_v28 = vxor.u32 2147483648, %v1461_v17  ;;  %v1520_v14 = vsel %vm1516_vm12, %v1504_v53, %v1519_v24  ;;  %vm1515_vm13 = vcmp.lt.s32.totalorder %v1495_v29, 2  ;;  %v1524_v49 = vsel %vm1516_vm12, %v1507_v31, %v1523_v26 }
 0x183   :  { %v1342_v16 = vclz %v1611_v12  ;;  %v1526_v23 = vsel %vm1514_vm10, %v1504_v53, %v1507_v31  ;;  %v1525_v56 = vsel %vm1515_vm13, %v1522_v2, %v1524_v49  ;;  %v1527_v1 = vsel %vm1517_vm11, %v1513_v18, 1326507024 }
 0x184   :  { %v1463_v25 = vsel %vm1380_vm1, %v1462_v28, %v1461_v17  ;;  %vm1265_vm14 = vcmp.lt.s32.totalorder %v2316_v39, 2  ;;  %v1521_v0 = vsel %vm1515_vm13, %v1518_v19, %v1520_v14  ;;  %v1528_v41 = vsel %vm1516_vm12, %v1510_v15, %v1527_v1 }
 0x185   :  { %v1466_v38 = vsel %vm2301_vm7, %v2143_v57, %v1463_v25  ;;  %v1612_v40 = vadd.s32 4294967294, %v1342_v16  ;;  %v1529_v20 = vsel %vm1515_vm13, %v1526_v23, %v1528_v41  ;;  %vm1266_vm0 = vcmp.eq.s32.totalorder %v2316_v39, 0 }
 0x186   :  { %v1771_v44 = vpop.eup %1770  ;;  %1774 = vcosq.f32 %v1466_v38  ;;  %v2353_v50 = vmul.u32.u64.low %v1530_v47, %v1525_v56  ;;  %v2354_v58 = vmul.u32.u64.high %v1530_v47, %v1525_v56, %v2353_v50  ;;  %v1330_v63 = vadd.s32 %v2286_v36, %v2297_v52 }
 0x187   :  { %v1773_v59 = vpop.eup %1772  ;;  %1776 = vsinq.f32 %v1466_v38  ;;  %vm1613_vm15 = vcmp.lt.s32.totalorder %v1612_v40, 0  ;;  %v2357_v60 = vmul.u32.u64.low %v1530_v47, %v1529_v20  ;;  %v2358_v7 = vmul.u32.u64.high %v1530_v47, %v1529_v20, %v2357_v60 }
 0x188   :  { %v1345_v8 = vsel %vm1613_vm15, 0, %v1612_v40  ;;  %v1267_v62 = vxor.u32 2147483648, %v1773_v59  ;;  %v1270_v3 = vxor.u32 2147483648, %v1771_v44  ;;  %vm1269_vm1 = vcmp.eq.s32.totalorder %v2316_v39, 2 }
 0x189   :  { %v1346_v22 = vsub.s32 32, %v1345_v8  ;;  %v1350_v55 = vsub.s32 4294967266, %v1345_v8  ;;  %v1537_v35 = vmul.u32 %v1530_v47, %v1521_v0  ;;  %v1540_v54 = vadd.s32 1, %v2354_v58 }
 0x18a   :  { %v1268_v27 = vsel %vm1266_vm0, %v1771_v44, %v1267_v62  ;;  %v1271_v34 = vsel %vm1269_vm1, %v1270_v3, %v1773_v59  ;;  %v1347_v37 = vshll.u32 %v2335_v43, %v1345_v8  ;;  %vm1539_vm2 = vc.u32 %v2358_v7, %v2353_v50 }
 0x18b   :  { %v1348_v29 = vshrl.u32 %v1330_v63, %v1346_v22  ;;  %v1351_v42 = vadd.s32 127, %v1350_v55  ;;  %v1541_v30 = vsel %vm1539_vm2, %v1540_v54, %v2354_v58  ;;  %vm1262_vm3 = vweird.f32 %v2137_v46 }
 0x18c   :  { %v1272_v36 = vsel %vm1265_vm14, %v1268_v27, %v1271_v34  ;;  %v1542_v31 = vadd.s32 %v1541_v30, %v1537_v35  ;;  %v1472_v5 = vand.u32 3, %v2319_v45  ;;  %v1360_v46 = vsub.s32 4, %v2323_v9 }
 0x18d   :  { %v1349_v52 = vor.u32 %v1348_v29, %v1347_v37  ;;  %v1352_v53 = vshll.u32 %v1351_v42, 23  ;;  %v1273_v11 = vsel %vm1262_vm3, nan, %v1272_v36  ;;  %vm1470_vm7 = vweird.f32 %v2143_v57 }
 0x18e   :  { %1586 = vst [vmem:[#allocation7] sm:$0xff] %v1273_v11  ;;  %v1543_v6 = vadd.s32 536870912, %v1542_v31  ;;  %vm1477_vm4 = vcmp.eq.s32.totalorder %v1472_v5, 2  ;;  %vm1474_vm5 = vcmp.eq.s32.totalorder %v1472_v5, 0  ;;  %vm1473_vm6 = vcmp.lt.s32.totalorder %v1472_v5, 2 }
 0x18f   :  { %v1353_v43 = vor.u32 4788187, %v1352_v53  ;;  %v1356_v13 = vcvt.s32.f32 %v1349_v52  ;;  %vm1276_vm8 = vcmp.lt.s32.totalorder %v2139_v48, 0  ;;  %vm1275_vm9 = vcmp.le.f32.partialorder %v1274_v4, 0.7853982 }
 0x190   :  { %v1775_v10 = vpop.eup %1774  ;;  %v2373_v61 = vshrl.u32 %v1543_v6, 30  ;;  %v1361_v2 = vsel %vm1276_vm8, %v1360_v46, %v2323_v9  ;;  %v1538_v4 = vadd.s32 %v2353_v50, %v2358_v7  ;;  %vm1366_vm14 = vweird.f32 %v2139_v48 }
 0x191   :  { %v1777_v51 = vpop.eup %1776  ;;  %v1354_v32 = vand.u32 2147483647, %v1353_v43  ;;  %v1478_v15 = vxor.u32 2147483648, %v1775_v10  ;;  %v1363_v23 = vsel %vm1275_vm9, 0, %v1361_v2  ;;  %vm1484_vm15 = vcmp.lt.s32.totalorder %v2157_v21, 0 }
 0x192   :  { %v1475_v39 = vxor.u32 2147483648, %v1777_v51  ;;  %v1545_v17 = vshll.u32 %v2373_v61, 30  ;;  %v1367_v57 = vadd.s32 3, %v1363_v23  ;;  %v1568_v27 = vsub.s32 4, %v2373_v61 }
 0x193   :  { %v1357_v47 = vmul.f32 %v1356_v13, %v1354_v32  ;;  %v1479_v18 = vsel %vm1477_vm4, %v1478_v15, %v1777_v51  ;;  %vm1483_vm0 = vcmp.le.f32.partialorder %v1482_v33, 0.7853982  ;;  %vm1574_vm4 = vweird.f32 %v2157_v21 }
 0x194   :  { %v1476_v45 = vsel %vm1474_vm5, %v1775_v10, %v1475_v39  ;;  %v1546_v19 = vsub.s32 %v1542_v31, %v1545_v17  ;;  %v1368_v38 = vand.u32 3, %v1367_v57  ;;  %v1569_v29 = vsel %vm1484_vm15, %v1568_v27, %v2373_v61 }
 0x195   :  { %v1358_v12 = vxor.u32 2147483648, %v1357_v47  ;;  %v1480_v24 = vsel %vm1473_vm6, %v1476_v45, %v1479_v18 }
 0x196   :  { %v1481_v28 = vsel %vm1470_vm7, nan, %v1480_v24  ;;  %v1548_v26 = vsub.s32 0, %v1546_v19  ;;  %vm1373_vm11 = vcmp.eq.s32.totalorder %v1368_v38, 2  ;;  %vm1370_vm12 = vcmp.eq.s32.totalorder %v1368_v38, 0 }
 0x197   :  { %v1359_v14 = vsel %vm1276_vm8, %v1358_v12, %v1357_v47  ;;  %1588 = vst [vmem:[#allocation7 + $0x10] sm:$0xff] %v1481_v28  ;;  %vm1369_vm13 = vcmp.lt.s32.totalorder %v1368_v38, 2 }
 0x198   :  { %v1362_v16 = vsel %vm1275_vm9, %v2139_v48, %v1359_v14  ;;  %v1619_v49 = vmin.u32 %v1548_v26, %v1546_v19  ;;  %v1571_v48 = vsel %vm1483_vm0, 0, %v1569_v29 }
 0x199   :  { %1778 = vcosq.f32 %v1362_v16  ;;  %v1575_v30 = vadd.s32 3, %v1571_v48 }
 0x19a   :  { %1780 = vsinq.f32 %v1362_v16  ;;  %v1550_v25 = vclz %v1619_v49 }
 0x19b   :  { %v1576_v36 = vand.u32 3, %v1575_v30 }
 0x19c   :  { %v1620_v56 = vadd.s32 4294967294, %v1550_v25 }
 0x19d   :  { %vm1581_vm1 = vcmp.eq.s32.totalorder %v1576_v36, 2  ;;  %vm1578_vm2 = vcmp.eq.s32.totalorder %v1576_v36, 0  ;;  %vm1577_vm3 = vcmp.lt.s32.totalorder %v1576_v36, 2 }
 0x19e   :  { %vm1621_vm10 = vcmp.lt.s32.totalorder %v1620_v56, 0 }
 0x19f   :  { %v1553_v1 = vsel %vm1621_vm10, 0, %v1620_v56 }
 0x1a0   :  { %v1554_v40 = vsub.s32 32, %v1553_v1  ;;  %v1558_v0 = vsub.s32 4294967266, %v1553_v1  ;;  %v1555_v41 = vshll.u32 %v1546_v19, %v1553_v1 }
 0x1a2   :  { %v1556_v44 = vshrl.u32 %v1538_v4, %v1554_v40  ;;  %v1559_v20 = vadd.s32 127, %v1558_v0 }
 0x1a3   :  { %v1779_v9 = vpop.eup %1778 }
 0x1a4   :  { %v1781_v58 = vpop.eup %1780  ;;  %v1374_v59 = vxor.u32 2147483648, %v1779_v9  ;;  %v1557_v60 = vor.u32 %v1556_v44, %v1555_v41  ;;  %v1560_v8 = vshll.u32 %v1559_v20, 23 }
 0x1a5   :  { %v1371_v62 = vxor.u32 2147483648, %v1781_v58 }
 0x1a6   :  { %v1375_v3 = vsel %vm1373_vm11, %v1374_v59, %v1781_v58  ;;  %v1561_v63 = vor.u32 4788187, %v1560_v8  ;;  %v1564_v55 = vcvt.s32.f32 %v1557_v60 }
 0x1a7   :  { %v1372_v22 = vsel %vm1370_vm12, %v1779_v9, %v1371_v62 }
 0x1a8   :  { %v1376_v50 = vsel %vm1369_vm13, %v1372_v22, %v1375_v3  ;;  %v1562_v7 = vand.u32 2147483647, %v1561_v63 }
 0x1a9   :  { %v1377_v35 = vsel %vm1366_vm14, nan, %v1376_v50 }
 0x1aa   :  { %1587 = vst [vmem:[#allocation7 + $0x8] sm:$0xff] %v1377_v35  ;;  %v1565_v54 = vmul.f32 %v1564_v55, %v1562_v7 }
 0x1ac   :  { %v1566_v34 = vxor.u32 2147483648, %v1565_v54 }
 0x1ae   :  { %v1567_v37 = vsel %vm1484_vm15, %v1566_v34, %v1565_v54 }
 0x1af   :  { %v1570_v42 = vsel %vm1483_vm0, %v2157_v21, %v1567_v37 }
 0x1b0   :  { %1782 = vcosq.f32 %v1570_v42 }
 0x1b1   :  { %1784 = vsinq.f32 %v1570_v42 }
 0x1ba   :  { %v1783_v52 = vpop.eup %1782 }
 0x1bb   :  { %v1785_v53 = vpop.eup %1784  ;;  %v1582_v31 = vxor.u32 2147483648, %v1783_v52 }
 0x1bc   :  { %v1579_v11 = vxor.u32 2147483648, %v1785_v53 }
 0x1bd   :  { %v1583_v5 = vsel %vm1581_vm1, %v1582_v31, %v1785_v53 }
 0x1be   :  { %v1580_v33 = vsel %vm1578_vm2, %v1783_v52, %v1579_v11 }
 0x1bf   :  { %v1584_v43 = vsel %vm1577_vm3, %v1580_v33, %v1583_v5 }
 0x1c0   :  { %v1585_v6 = vsel %vm1574_vm4, nan, %v1584_v43 }
 0x1c1   :  { %1589 = vst [vmem:[#allocation7 + $0x18] sm:$0xff] %v1585_v6 }
 0x1c2   :  { %1841 = shalt.err (!%p1838_p6)
}
 0x1c3   :  { %s1842_s15 = scalar_lea.hbm %s2408_s3, 512 }
 0x1c4   :  { %p1843_p7 = scmp.ne.s32.totalorder %s2408_s3, %s1842_s15  ;;  %p1846_p8 = scmp.lt.u32.totalorder %s1842_s15, %s2408_s3 }
 0x1c6   :  { %p1848_p9 = pnand %p1846_p8, %p1843_p7 }
 0x1c8   :  { %1851 = shalt.err (!%p1848_p9)
}
 0x1c9   :  { %1599 = dma.vmem_to_hbm [thread:$0]  %s1597_s11, 512, %s2408_s3, [#allocation4]  }
 0x1ca   :  { %1856 = dma.done.wait [#allocation4], 512  }
 0x1cb   :  { %1857 = vsyncadd [#allocation4], 4294966784 }
 0x1cc   :  { %1603 = vsyncpa [#allocation3], 1 }
 0x1cd   :  { %1604 = vsyncpa [#allocation6], 1 }
 0x1ce   :  { %1605 = vsyncpa [#allocation4], 1 }

</bundles_post_ra>
